<compile_context>
chip_gen: v5e
topology: v5e:2x2
jax: 0.10.0
libtpu: 0.0.40
codegen_flags: <defaults>
</compile_context>

<pallas_src>
import jax
import jax.numpy as jnp
from jax.experimental import pallas as pl
from jax.experimental.pallas import tpu as pltpu


def _logreg_kernel(x_ref, w_ref, b_ref, o_ref):
    """One batch tile.

    x_ref: (TILE_N, F)    f32 VMEM  -- streamed / double-buffered batch tile
    w_ref: (1, F)         f32 VMEM  -- lane-dense weight row, resident (same block)
    b_ref: (1, 1)         f32 SMEM  -- bias scalar
    o_ref: (1, 1, TILE_N) f32 VMEM  -- lane-dense output slab (unmasked stores)
    """
    x = x_ref[...]
    w = w_ref[...]
    # Memory-bound matvec: VPU multiply + XLU lane reduction.  Keep the MXU out of it.
    z = jnp.sum(x * w, axis=-1, keepdims=True)            # (TILE_N, 1) f32
    y = jax.nn.sigmoid(z + b_ref[0, 0])                   # EUP transcendental (free slot)
    # Tiny sublane->lane relayout (TILE_N scalars) so the output store is lane-dense.
    o_ref[...] = y.reshape(1, 1, -1).astype(o_ref.dtype)


def _choose_tile_n(n: int, f: int, max_rows: int):
    """Pick a batch tile that (a) keeps the double-buffered x tile well inside scoped
    VMEM on every chip (v7x has only 64 MiB physical VMEM), (b) is big enough to
    amortize per-step pipeline overhead, and (c) balances tiles so the ragged last
    block wastes at most a few rows."""
    budget_bytes = 6 * 1024 * 1024                    # per x buffer (x2 double buffer)
    cap = max(8, min(max_rows, budget_bytes // (f * 4)))
    cap = (cap // 8) * 8                              # sublane multiple
    num_tiles = pl.cdiv(n, cap)
    tile_n = ((pl.cdiv(n, num_tiles) + 7) // 8) * 8   # balanced, multiple of 8
    return tile_n, num_tiles


def logistic_regression(x, weight, bias, *, max_tile_rows: int = 8192):
    """Forward of nn.Linear(F, 1) + sigmoid.  x: (N, F); weight: (1, F); bias: (1,)."""
    n, f = x.shape
    x = x.astype(jnp.float32)
    w_row = weight.reshape(1, f).astype(jnp.float32)      # lane-dense (1, F)
    b = bias.reshape(1, 1).astype(jnp.float32)

    tile_n, num_tiles = _choose_tile_n(n, f, max_tile_rows)

    out = pl.pallas_call(
        _logreg_kernel,
        out_shape=jax.ShapeDtypeStruct((num_tiles, 1, tile_n), jnp.float32),
        grid_spec=pltpu.PrefetchScalarGridSpec(
            num_scalar_prefetch=0,
            grid=(num_tiles,),
            in_specs=[
                # x: tile the batch axis -> double-buffered HBM->VMEM pipeline.
                # Last block may run past N; Pallas does a bounded copy and we
                # discard the garbage rows in the wrapper slice (no jnp.pad copy).
                pl.BlockSpec((tile_n, f), lambda i: (i, 0)),
                # weight: same block every step -> stays resident in VMEM.
                pl.BlockSpec((1, f), lambda i: (0, 0)),
                # bias: single scalar, keep it in SMEM.
                pl.BlockSpec(memory_space=pltpu.MemorySpace.SMEM),
            ],
            out_specs=pl.BlockSpec((1, 1, tile_n), lambda i: (i, 0, 0)),
        ),
        compiler_params=pltpu.CompilerParams(
            # Batch axis is independent -> megacore (v7x: 2 TCs) can shard the grid.
            dimension_semantics=("parallel",),
            # Double-buffered x tile (<= ~12 MiB) + weight + output slab; explicit
            # limit so v5e's 16 MiB default doesn't bite and v7x keeps headroom.
            vmem_limit_bytes=32 * 1024 * 1024,
        ),
        cost_estimate=pl.CostEstimate(
            flops=2 * n * f + 2 * n,
            transcendentals=n,
            bytes_accessed=(n * f + n + f + 1) * 4,
        ),
    )(x, w_row, b)

    # Layout plumbing only: lane-dense slab back to (N, 1), dropping ragged tail.
    return out.reshape(num_tiles * tile_n, 1)[:n]


# TODO(synk): for very large F add a second ("arbitrary") reduction grid axis over F
# with a VMEM accumulator to keep the per-block x tile bounded on v7x.


if __name__ == "__main__":
    key = jax.random.PRNGKey(0)
    kx, kw, kb, kx2 = jax.random.split(key, 4)

    batch = 8
    in_features = 32

    x = jax.random.normal(kx, (batch, in_features), dtype=jnp.float32)
    # Deterministic parameter init (mimics nn.Linear uniform(-1/sqrt(F), 1/sqrt(F))).
    bound = 1.0 / jnp.sqrt(jnp.float32(in_features))
    weight = jax.random.uniform(kw, (1, in_features), minval=-bound, maxval=bound,
                                dtype=jnp.float32)
    bias = jax.random.uniform(kb, (1,), minval=-bound, maxval=bound,
                              dtype=jnp.float32)

    # Small-shape run consistent with the module.
    y = logistic_regression(x, weight, bias)
    jax.block_until_ready(y)
    y_ref = jax.nn.sigmoid(x @ weight.T + bias)
    assert y.shape == (batch, 1)
    assert jnp.allclose(y, y_ref, atol=1e-5, rtol=1e-5)

    # Also exercise the tiled + ragged-tail path (grid > 1, last x block partial).
    n_big = 260
    x2 = jax.random.normal(kx2, (n_big, in_features), dtype=jnp.float32)
    y2 = logistic_regression(x2, weight, bias, max_tile_rows=128)
    jax.block_until_ready(y2)
    y2_ref = jax.nn.sigmoid(x2 @ weight.T + bias)
    assert y2.shape == (n_big, 1)
    assert jnp.allclose(y2, y2_ref, atol=1e-5, rtol=1e-5)

    print("KERNEL_OK")
</pallas_src>

<mosaic_0001>
module attributes {stable_mosaic.version = 11 : i64} {
  func.func @_logreg_kernel(%arg0: i32, %arg1: memref<8x32xf32, #tpu.memory_space<vmem>>, %arg2: memref<1x32xf32, #tpu.memory_space<vmem>>, %arg3: memref<1x1xf32, #tpu.memory_space<smem>>, %arg4: memref<1x1x8xf32, #tpu.memory_space<vmem>>) attributes {dimension_semantics = [#tpu.dimension_semantics<parallel>], iteration_bounds = array<i64: 1>, scalar_prefetch = 0 : i64, scratch_operands = 0 : i64, tpu.core_type = #tpu.core_type<tc>, window_params = [{transform_indices = @transform_0, window_bounds = array<i64: 8, 32>}, {pipeline_mode = #tpu.pipeline_mode<synchronous>, transform_indices = @transform_1, window_bounds = array<i64: 1, 32>}, {transform_indices = @transform_2, window_bounds = array<i64: 1, 1>}, {transform_indices = @transform_3, window_bounds = array<i64: 1, 1, 8>}]} {
    %c0 = arith.constant 0 : index
    %c0_0 = arith.constant 0 : index
    %0 = vector.load %arg1[%c0, %c0_0] : memref<8x32xf32, #tpu.memory_space<vmem>>, vector<8x32xf32>
    %c0_1 = arith.constant 0 : index
    %c0_2 = arith.constant 0 : index
    %1 = vector.load %arg2[%c0_1, %c0_2] : memref<1x32xf32, #tpu.memory_space<vmem>>, vector<1x32xf32>
    %2 = vector.broadcast %1 : vector<1x32xf32> to vector<8x32xf32>
    %3 = arith.mulf %0, %2 : vector<8x32xf32>
    %cst = arith.constant dense<0.000000e+00> : vector<8xf32>
    %4 = vector.multi_reduction <add>, %3, %cst [1] : vector<8x32xf32> to vector<8xf32>
    %5 = vector.shape_cast %4 : vector<8xf32> to vector<8x1xf32>
    %c0_3 = arith.constant 0 : index
    %c0_4 = arith.constant 0 : index
    %6 = memref.load %arg3[%c0_3, %c0_4] : memref<1x1xf32, #tpu.memory_space<smem>>
    %7 = vector.broadcast %6 : f32 to vector<8x1xf32>
    %8 = arith.addf %5, %7 : vector<8x1xf32>
    %9 = arith.negf %8 : vector<8x1xf32>
    %10 = math.exp %9 : vector<8x1xf32>
    %cst_5 = arith.constant 1.000000e+00 : f32
    %11 = vector.broadcast %cst_5 : f32 to vector<8x1xf32>
    %12 = arith.addf %11, %10 : vector<8x1xf32>
    %13 = arith.divf %11, %12 : vector<8x1xf32>
    %14 = vector.shape_cast %13 : vector<8x1xf32> to vector<1x1x8xf32>
    %c0_6 = arith.constant 0 : index
    %c0_7 = arith.constant 0 : index
    %c0_8 = arith.constant 0 : index
    %15 = vector.load %arg4[%c0_6, %c0_7, %c0_8] : memref<1x1x8xf32, #tpu.memory_space<vmem>>, vector<1x1x8xf32>
    tpu.vector_store %arg4[%c0_6, %c0_7, %c0_8], %14 {strides = array<i32>} : memref<1x1x8xf32, #tpu.memory_space<vmem>>, vector<1x1x8xf32>,
    return
  }
  func.func @transform_0(%arg0: i32) -> (i32, i32) {
    %c0_i32 = arith.constant 0 : i32
    %c0_i32_0 = arith.constant 0 : i32
    return %arg0, %c0_i32 : i32, i32
  }
  func.func @transform_1(%arg0: i32) -> (i32, i32) {
    %c0_i32 = arith.constant 0 : i32
    %c0_i32_0 = arith.constant 0 : i32
    %c0_i32_1 = arith.constant 0 : i32
    return %c0_i32, %c0_i32_0 : i32, i32
  }
  func.func @transform_2(%arg0: i32) -> (i32, i32) {
    %c0_i32 = arith.constant 0 : i32
    %c0_i32_0 = arith.constant 0 : i32
    %c0_i32_1 = arith.constant 0 : i32
    return %c0_i32, %c0_i32_0 : i32, i32
  }
  func.func @transform_3(%arg0: i32) -> (i32, i32, i32) {
    %c0_i32 = arith.constant 0 : i32
    %c0_i32_0 = arith.constant 0 : i32
    %c0_i32_1 = arith.constant 0 : i32
    return %arg0, %c0_i32, %c0_i32_0 : i32, i32, i32
  }
}

</mosaic_0001>

<bundles_post_ra>
// kernel: tpu_custom_call.1
= control target key start
LH: loop header
LB: loop body
LE: loop exit
PB: predicated region body
PF: predicated region fallthrough
CT: control target
= control target key end

     0   :  { %9 = vsyncpa [#allocation4], 0  ;;  %s180_s0 = inlined_call_operand.hbm [shape: f32[8,32], index: 0, kind: input, shape index: {}]   ;;  %s181_s1 = inlined_call_operand.vmem [shape: f32[1,32], index: 1, kind: input, shape index: {}]   ;;  %s182_s2 = inlined_call_operand.<no memory space> [shape: f32[1,1], index: 2, kind: input, shape index: {}]   ;;  %s183_s3 = inlined_call_operand.hbm [shape: f32[1,1,8], index: 3, kind: output, shape index: {}]  }
   0x1   :  { %10 = vsyncpa [#allocation5], 0  ;;  %s16_s14 = sshll.u32 %s180_s0, 4  ;;  %s146_s15 = smov [#allocation3]   ;;  %s17_s14 = int_to_ptr.hbm [resolvable:$true] %s16_s14 }
   0x2   :  { %s18_s16 = sshll.u32 %s146_s15, 4  ;;  %s19_s16 = int_to_ptr.vmem [resolvable:$true] %s18_s16 }
   0x3   :  { %21 = dma.hbm_to_vmem [thread:$0]  %s17_s14, 128, %s19_s16, [#allocation4]  }
   0x4   :  { %142 = dma.done.wait [#allocation4], 128  }
   0x5   :  { %143 = vsyncadd [#allocation4], 4294967168  ;;  %v30_v0 = vld [vmem:[#allocation3] sm:$0xff]  ;;  %vm36_vm0 = vcmask 261120   ;;  %v41_v4 = vstv %s182_s2  ;;  %v63_v13 = vlaneseq  ;;  %s147_s0 = smov [#allocation6]   ;;  %s76_s22 = sshll.u32 %s183_s3, 4  ;;  %s77_s22 = int_to_ptr.hbm [resolvable:$true] %s76_s22 }
   0x6   :  { %v89_v1 = vld [vmem:[%s181_s1] ss:$0 sm:$0xff]  ;;  %s74_s1 = sshll.u32 %s147_s0, 4  ;;  %vm67_vm5 = vcmask 57344   ;;  %s75_s1 = int_to_ptr.vmem [resolvable:$true] %s74_s1 }
   0x7   :  { %v35_v2 = vmul.f32 %v89_v1, %v30_v0  ;;  %v64_v18 = vand.u32 127, %v63_v13 }
   0x9   :  { %v37_v3 = vsel %vm36_vm0, %v35_v2, 0.0 }
   0xa   :  { %38 = vadd.xlane.f32.xlu0 %v37_v3 }
  0x7d   :  { %v39_v5 = vpop.xlane.xlu0 %38 }
  0x7e   :  { %v42_v6 = vadd.f32 %v41_v4, %v39_v5 }
  0x80   :  { %v86_v7 = vmul.f32 -1.442695, %v42_v6 }
  0x82   :  { %90 = vpow2.f32 %v86_v7 }
  0x88   :  { %v91_v8 = vpop.eup %90 }
  0x89   :  { %v46_v9 = vadd.f32 1.0, %v91_v8 }
  0x8b   :  { %92 = vrcp.f32 %v46_v9  ;;  %v58_v14 = vand.u32 2147483648, %v46_v9  ;;  %v56_v16 = vand.u32 2147483647, %v46_v9  ;;  %vm52_vm2 = vweird.f32 %v46_v9 }
  0x8d   :  { %v59_v19 = vor.u32 1.1754944e-38, %v58_v14  ;;  %vm57_vm4 = vcmp.eq.f32.partialorder %v56_v16, 8.507059e+37 }
  0x91   :  { %v93_v10 = vpop.eup %92 }
  0x92   :  { %v48_v11 = vmul.f32 %v93_v10, %v46_v9  ;;  %vm53_vm1 = vweird.f32 %v93_v10 }
  0x93   :  { %vm54_vm3 = vmor %vm52_vm2, %vm53_vm1 }
  0x94   :  { %v49_v12 = vsub.f32 1.0, %v48_v11 }
  0x96   :  { %v50_v15 = vmul.f32 %v93_v10, %v49_v12 }
  0x98   :  { %v51_v17 = vadd.f32 %v93_v10, %v50_v15 }
  0x9a   :  { %v55_v20 = vsel %vm54_vm3, %v93_v10, %v51_v17 }
  0x9b   :  { %v60_v21 = vsel %vm57_vm4, %v59_v19, %v55_v20 }
  0x9c   :  { %v65_v22 = vperm.slane %v60_v21, %v64_v18 }
  0x9e   :  { %68 = vst.msk [vmem:[#allocation6] sm:$0x1] %vm67_vm5, %v65_v22 }
  0x9f   :  { %79 = dma.vmem_to_hbm [thread:$0]  %s75_s1, 16, %s77_s22, [#allocation5]  }
  0xa0   :  { %144 = dma.done.wait [#allocation5], 16  }
  0xa1   :  { %145 = vsyncadd [#allocation5], 4294967280 }
  0xa2   :  { %84 = vsyncpa [#allocation4], 1 }
  0xa3   :  { %85 = vsyncpa [#allocation5], 1 }

</bundles_post_ra>
